<compile_context>
chip_gen: v7x
topology: tpu7x:2x2x1
jax: 0.10.0
libtpu: 0.0.40
codegen_flags: <defaults>
</compile_context>

<pallas_src>
import functools

import jax
import jax.numpy as jnp
from jax.experimental import pallas as pl
from jax.experimental.pallas import tpu as pltpu

SUBLANE = 8  # f32 sublane height


def _round_up(n, m):
    return ((n + m - 1) // m) * m


def combine_kernel(x_ref, w1_ref, b1_ref, w2_ref, b2_ref, o_ref):
    # x_ref : (TB, D_in)      f32   (streamed, unpadded)
    # w1_ref: (D_in, D_mid)   f32,  b1_ref: (1, D_mid) f32   (VMEM-resident, DMA'd once)
    # w2_ref: (D_mid, D_out)  f32,  b2_ref: (1, D_out) f32
    # o_ref : (TB, D_out)     f32   (unpadded; masked vst is cheaper than 4x padded DMA)
    #
    # bf16 operands on the MXU, f32 accumulation; the casts are VPU work that hides
    # under the activation DMA bottleneck.
    x = x_ref[...].astype(jnp.bfloat16)

    # Stage 1: Linear(D_in -> D_mid) + bias + ReLU
    h = jnp.dot(x, w1_ref[...].astype(jnp.bfloat16), preferred_element_type=jnp.float32)
    h = jnp.maximum(h + b1_ref[...], 0.0)

    # Stage 2: Linear(D_mid -> D_out) + bias
    y = jnp.dot(h.astype(jnp.bfloat16), w2_ref[...].astype(jnp.bfloat16),
                preferred_element_type=jnp.float32)
    o_ref[...] = (y + b2_ref[...]).astype(o_ref.dtype)


@functools.partial(jax.jit, static_argnames=("block_b",))
def combine_model_forward(x, w1, b1, w2, b2, *, block_b=1024):
    """Fused forward of CombineModel(Linear+ReLU, Linear). x: (B, D_in) f32."""
    B, D_in = x.shape
    D_mid = w1.shape[1]
    D_out = w2.shape[1]

    # Batch tile: sublane-aligned; aim for >= 4 grid steps (>= 2 tiles per v7x
    # TensorCore so double-buffering overlap exists), capped at block_b rows.
    tb = min(block_b, max(SUBLANE, _round_up(pl.cdiv(B, 4), SUBLANE)))
    grid = (pl.cdiv(B, tb),)

    flops = 2 * B * (D_in * D_mid + D_mid * D_out)
    bytes_accessed = 4 * (B * D_in + B * D_out
                          + D_in * D_mid + D_mid + D_mid * D_out + D_out)

    out = pl.pallas_call(
        combine_kernel,
        out_shape=jax.ShapeDtypeStruct((B, D_out), jnp.float32),
        grid_spec=pltpu.PrefetchScalarGridSpec(
            num_scalar_prefetch=0,
            grid=grid,
            in_specs=[
                # Streamed activations, unpadded (last dim == full extent is legal).
                pl.BlockSpec((tb, D_in), lambda i: (i, 0)),
                # Weights / biases: constant block index -> DMA'd once, VMEM-resident.
                pl.BlockSpec((D_in, D_mid), lambda i: (0, 0)),
                pl.BlockSpec((1, D_mid), lambda i: (0, 0)),
                pl.BlockSpec((D_mid, D_out), lambda i: (0, 0)),
                pl.BlockSpec((1, D_out), lambda i: (0, 0)),
            ],
            out_specs=pl.BlockSpec((tb, D_out), lambda i: (i, 0)),
        ),
        compiler_params=pltpu.CompilerParams(
            # Batch tiles are independent -> shard across v7x's two TensorCores
            # (harmless on single-TC v5e/v6e).
            dimension_semantics=("parallel",),
        ),
        cost_estimate=pl.CostEstimate(
            flops=flops, transcendentals=0, bytes_accessed=bytes_accessed),
    )(x, w1, b1, w2, b2)

    return out.astype(x.dtype)


def reference_forward(x, w1, b1, w2, b2):
    # Same math as the kernel: bf16 matmul operands, f32 accumulation / bias / ReLU.
    h = jnp.dot(x.astype(jnp.bfloat16), w1.astype(jnp.bfloat16),
                preferred_element_type=jnp.float32)
    h = jnp.maximum(h + b1.astype(jnp.float32), 0.0)
    y = jnp.dot(h.astype(jnp.bfloat16), w2.astype(jnp.bfloat16),
                preferred_element_type=jnp.float32)
    return (y + b2.astype(jnp.float32)).astype(x.dtype)


# TODO(synk): CombineModel.load/save/state_dict are checkpoint I/O, not forward compute;
# they have no Pallas equivalent and are intentionally omitted.

if __name__ == "__main__":
    key = jax.random.PRNGKey(0)
    k_x, k_w1, k_b1, k_w2, k_b2 = jax.random.split(key, 5)

    # Small but realistic batched shape: with the auto tile choice this gives a 4-step
    # grid (256-row tiles), i.e. >= 2 tiles per v7x TensorCore and real DMA overlap.
    B, D_in, D_mid, D_out = 1024, 32, 64, 32

    x = jax.random.normal(k_x, (B, D_in), dtype=jnp.float32)
    # Deterministic parameter init (synthetic; not loaded from a checkpoint).
    w1 = jax.random.normal(k_w1, (D_in, D_mid), dtype=jnp.float32) * (1.0 / jnp.sqrt(D_in))
    b1 = jax.random.normal(k_b1, (1, D_mid), dtype=jnp.float32) * 0.01
    w2 = jax.random.normal(k_w2, (D_mid, D_out), dtype=jnp.float32) * (1.0 / jnp.sqrt(D_mid))
    b2 = jax.random.normal(k_b2, (1, D_out), dtype=jnp.float32) * 0.01

    out = combine_model_forward(x, w1, b1, w2, b2)
    out = jax.block_until_ready(out)

    ref = reference_forward(x, w1, b1, w2, b2)
    assert out.shape == (B, D_out)
    assert jnp.allclose(out, ref, atol=1e-2, rtol=1e-2), "Pallas kernel mismatch vs reference"

    print("KERNEL_OK")
</pallas_src>

<mosaic_0001>
module attributes {stable_mosaic.version = 11 : i64} {
  func.func @combine_kernel(%arg0: i32, %arg1: memref<256x32xf32, #tpu.memory_space<vmem>>, %arg2: memref<32x64xf32, #tpu.memory_space<vmem>>, %arg3: memref<1x64xf32, #tpu.memory_space<vmem>>, %arg4: memref<64x32xf32, #tpu.memory_space<vmem>>, %arg5: memref<1x32xf32, #tpu.memory_space<vmem>>, %arg6: memref<256x32xf32, #tpu.memory_space<vmem>>) attributes {dimension_semantics = [#tpu.dimension_semantics<parallel>], iteration_bounds = array<i64: 4>, scalar_prefetch = 0 : i64, scratch_operands = 0 : i64, tpu.core_type = #tpu.core_type<tc>, window_params = [{transform_indices = @transform_0, window_bounds = array<i64: 256, 32>}, {pipeline_mode = #tpu.pipeline_mode<synchronous>, transform_indices = @transform_1, window_bounds = array<i64: 32, 64>}, {pipeline_mode = #tpu.pipeline_mode<synchronous>, transform_indices = @transform_2, window_bounds = array<i64: 1, 64>}, {pipeline_mode = #tpu.pipeline_mode<synchronous>, transform_indices = @transform_3, window_bounds = array<i64: 64, 32>}, {pipeline_mode = #tpu.pipeline_mode<synchronous>, transform_indices = @transform_4, window_bounds = array<i64: 1, 32>}, {transform_indices = @transform_5, window_bounds = array<i64: 256, 32>}]} {
    %c0 = arith.constant 0 : index
    %c0_0 = arith.constant 0 : index
    %0 = vector.load %arg1[%c0, %c0_0] : memref<256x32xf32, #tpu.memory_space<vmem>>, vector<256x32xf32>
    %1 = arith.truncf %0 : vector<256x32xf32> to vector<256x32xbf16>
    %c0_1 = arith.constant 0 : index
    %c0_2 = arith.constant 0 : index
    %2 = vector.load %arg2[%c0_1, %c0_2] : memref<32x64xf32, #tpu.memory_space<vmem>>, vector<32x64xf32>
    %3 = arith.truncf %2 : vector<32x64xf32> to vector<32x64xbf16>
    %cst = arith.constant dense<0.000000e+00> : vector<256x64xf32>
    %4 = tpu.matmul %1, %3, %cst {dimension_numbers = #tpu.dot_dimension_numbers<[1], [0], [0], [1], [0, 0, 1, 1], [], []>} : vector<256x32xbf16>, vector<32x64xbf16>, vector<256x64xf32> -> vector<256x64xf32>
    %c0_3 = arith.constant 0 : index
    %c0_4 = arith.constant 0 : index
    %5 = vector.load %arg3[%c0_3, %c0_4] : memref<1x64xf32, #tpu.memory_space<vmem>>, vector<1x64xf32>
    %6 = vector.broadcast %5 : vector<1x64xf32> to vector<256x64xf32>
    %7 = arith.addf %4, %6 : vector<256x64xf32>
    %cst_5 = arith.constant 0.000000e+00 : f32
    %8 = vector.broadcast %cst_5 : f32 to vector<256x64xf32>
    %9 = arith.maximumf %7, %8 : vector<256x64xf32>
    %10 = arith.truncf %9 : vector<256x64xf32> to vector<256x64xbf16>
    %c0_6 = arith.constant 0 : index
    %c0_7 = arith.constant 0 : index
    %11 = vector.load %arg4[%c0_6, %c0_7] : memref<64x32xf32, #tpu.memory_space<vmem>>, vector<64x32xf32>
    %12 = arith.truncf %11 : vector<64x32xf32> to vector<64x32xbf16>
    %cst_8 = arith.constant dense<0.000000e+00> : vector<256x32xf32>
    %13 = tpu.matmul %10, %12, %cst_8 {dimension_numbers = #tpu.dot_dimension_numbers<[1], [0], [0], [1], [0, 0, 1, 1], [], []>} : vector<256x64xbf16>, vector<64x32xbf16>, vector<256x32xf32> -> vector<256x32xf32>
    %c0_9 = arith.constant 0 : index
    %c0_10 = arith.constant 0 : index
    %14 = vector.load %arg5[%c0_9, %c0_10] : memref<1x32xf32, #tpu.memory_space<vmem>>, vector<1x32xf32>
    %15 = vector.broadcast %14 : vector<1x32xf32> to vector<256x32xf32>
    %16 = arith.addf %13, %15 : vector<256x32xf32>
    %c0_11 = arith.constant 0 : index
    %c0_12 = arith.constant 0 : index
    %17 = vector.load %arg6[%c0_11, %c0_12] : memref<256x32xf32, #tpu.memory_space<vmem>>, vector<256x32xf32>
    tpu.vector_store %arg6[%c0_11, %c0_12], %16 {strides = array<i32>} : memref<256x32xf32, #tpu.memory_space<vmem>>, vector<256x32xf32>,
    return
  }
  func.func @transform_0(%arg0: i32) -> (i32, i32) {
    %c0_i32 = arith.constant 0 : i32
    %c0_i32_0 = arith.constant 0 : i32
    return %arg0, %c0_i32 : i32, i32
  }
  func.func @transform_1(%arg0: i32) -> (i32, i32) {
    %c0_i32 = arith.constant 0 : i32
    %c0_i32_0 = arith.constant 0 : i32
    %c0_i32_1 = arith.constant 0 : i32
    return %c0_i32, %c0_i32_0 : i32, i32
  }
  func.func @transform_2(%arg0: i32) -> (i32, i32) {
    %c0_i32 = arith.constant 0 : i32
    %c0_i32_0 = arith.constant 0 : i32
    %c0_i32_1 = arith.constant 0 : i32
    return %c0_i32, %c0_i32_0 : i32, i32
  }
  func.func @transform_3(%arg0: i32) -> (i32, i32) {
    %c0_i32 = arith.constant 0 : i32
    %c0_i32_0 = arith.constant 0 : i32
    %c0_i32_1 = arith.constant 0 : i32
    return %c0_i32, %c0_i32_0 : i32, i32
  }
  func.func @transform_4(%arg0: i32) -> (i32, i32) {
    %c0_i32 = arith.constant 0 : i32
    %c0_i32_0 = arith.constant 0 : i32
    %c0_i32_1 = arith.constant 0 : i32
    return %c0_i32, %c0_i32_0 : i32, i32
  }
  func.func @transform_5(%arg0: i32) -> (i32, i32) {
    %c0_i32 = arith.constant 0 : i32
    %c0_i32_0 = arith.constant 0 : i32
    return %arg0, %c0_i32 : i32, i32
  }
}

</mosaic_0001>

<bundles_post_ra>
// kernel: combine_model_forward.1
= control target key start
LH: loop header
LB: loop body
LE: loop exit
PB: predicated region body
PF: predicated region fallthrough
CT: control target
= control target key end

     0   :  { %s1070_s18 = smov 0   ;;  %s1336_s0 = inlined_call_operand.vmem [shape: f32[1024,32], index: 0, kind: input, shape index: {}]   ;;  %s1337_s1 = inlined_call_operand.vmem [shape: f32[32,64], index: 1, kind: input, shape index: {}]   ;;  %s1338_s2 = inlined_call_operand.vmem [shape: f32[1,64], index: 2, kind: input, shape index: {}]   ;;  %s1339_s3 = inlined_call_operand.vmem [shape: f32[64,32], index: 3, kind: input, shape index: {}]   ;;  %s1340_s4 = inlined_call_operand.vmem [shape: f32[1,32], index: 4, kind: input, shape index: {}]   ;;  %s1341_s5 = inlined_call_operand.vmem [shape: f32[1024,32], index: 5, kind: output, shape index: {}]  }
   0x1 LB: > { %s865_s19 = sadd.s32 4294967295, %s1038_s18   ;;  %p869_p0 = scmp.ge.s32.totalorder %s1038_s18, 1  ;;  %s1038_s18 = sphi %s1070_s18, %s15_s18  }
   0x2   : > { %p188_p1 = scmp.lt.s32.totalorder %s1038_s18, 5 }
   0x4   : > { %p189_p2 = pnand %p869_p0, %p188_p1 }
   0x5   : > { %v277_v0 = vld [vmem:[%s1337_s1] sm:$0xff] (!%p189_p2)  ;;  %v278_v1 = vld [vmem:[%s1337_s1 + $0x8] sm:$0xff] (!%p189_p2)  ;;  %v279_v2 = vld [vmem:[%s1337_s1 + $0x10] sm:$0xff] (!%p189_p2)  ;;  %s870_s26 = sshll.u32 (!%p189_p2), %s865_s19, 5  ;;  %vm290_vm0 = vcmask (!%p189_p2), 261120   ;;  %vm567_vm1 = vcmask (!%p189_p2), 523264  }
   0x6   : > { %192 = sbr.rel (%p189_p2) target bundleno = 516 (0x204), region = 40  ;;  %v281_v3 = vpack.c.bf16 (!%p189_p2), %v278_v1, %v277_v0  ;;  %v280_v4 = vld [vmem:[%s1337_s1 + $0x18] sm:$0xff] (!%p189_p2)  ;;  %p217_p3 = scmp.lt.s32.totalorder (!%p189_p2), %s870_s26, 127  ;;  %v548_v5 = vld [vmem:[%s1339_s3] sm:$0xff] (!%p189_p2)  ;;  %v549_v6 = vld [vmem:[%s1339_s3 + $0x8] sm:$0xff] (!%p189_p2) }
   0x7   : > { %v282_v7 = vpack.c.bf16 (!%p189_p2), %v280_v4, %v279_v2  ;;  %v556_v8 = vpack.c.bf16 (!%p189_p2), %v549_v6, %v548_v5  ;;  %v550_v9 = vld [vmem:[%s1339_s3 + $0x10] sm:$0xff] (!%p189_p2)  ;;  %v551_v10 = vld [vmem:[%s1339_s3 + $0x18] sm:$0xff] (!%p189_p2)  ;;  %v552_v60 = vld [vmem:[%s1339_s3 + $0x20] sm:$0xff] (!%p189_p2) }
   0x8   : > { %948 = vmatprep.subr.bf16.mxu0 (!%p189_p2), %v281_v3  ;;  %v557_v11 = vpack.c.bf16 (!%p189_p2), %v551_v10, %v550_v9  ;;  %v553_v61 = vld [vmem:[%s1339_s3 + $0x28] sm:$0xff] (!%p189_p2)  ;;  %v554_v63 = vld [vmem:[%s1339_s3 + $0x30] sm:$0xff] (!%p189_p2)  ;;  %v555_v0 = vld [vmem:[%s1339_s3 + $0x38] sm:$0xff] (!%p189_p2) }
   0x9   : > { %949 = vmatpush3.bf16.msra.mxu0 (!%p189_p2), %v281_v3  ;;  %984 = vmatprep.subr.bf16.mxu1 (!%p189_p2), %v556_v8  ;;  %v558_v62 = vpack.c.bf16 (!%p189_p2), %v553_v61, %v552_v60  ;;  %v559_v1 = vpack.c.bf16 (!%p189_p2), %v555_v0, %v554_v63  ;;  %v1175_v2 = vld [vmem:[%s1338_s2] ss:$0 sm:$0xff] (!%p189_p2) }
   0xa   : > { %950 = vmatprep.subr.bf16.mxu0 (!%p189_p2), %v282_v7  ;;  %985 = vmatpush3.bf16.msra.mxu1 (!%p189_p2), %v556_v8 }
   0xb   : > { %986 = vmatprep.subr.bf16.mxu1 (!%p189_p2), %v557_v11 }
   0xd   : > { %s1343_s26 = smov (!%p217_p3, %s870_s26), 127  ;;  %951 = vmatpush3.bf16.msra.mxu0 %v282_v7 }
   0xe   : > { %s871_s12 = sshll.u32 %s1343_s26, 3  ;;  %987 = vmatpush3.bf16.msra.mxu1 %v557_v11 }
   0xf   : > { %s1110_s15 = scalar_lea.vmem %s1336_s0, %s871_s12  ;;  %988 = vmatprep.subr.bf16.mxu1 %v558_v62  ;;  %s1235_s7 = scalar_lea.vmem %s1341_s5, %s871_s12 }
  0x10   : > { %v229_v12 = vld [vmem:[%s1110_s15] sm:$0xff]  ;;  %v230_v13 = vld [vmem:[%s1110_s15 + $0x8] sm:$0xff]  ;;  %v231_v14 = vld [vmem:[%s1110_s15 + $0x10] sm:$0xff] }
  0x11   : > { %v261_v15 = vpack.c.bf16 %v230_v13, %v229_v12  ;;  %v232_v16 = vld [vmem:[%s1110_s15 + $0x18] sm:$0xff]  ;;  %v233_v17 = vld [vmem:[%s1110_s15 + $0x20] sm:$0xff]  ;;  %v234_v18 = vld [vmem:[%s1110_s15 + $0x28] sm:$0xff] }
  0x12   : > { %v262_v19 = vpack.c.bf16 %v232_v16, %v231_v14  ;;  %v263_v20 = vpack.c.bf16 %v234_v18, %v233_v17  ;;  %v235_v21 = vld [vmem:[%s1110_s15 + $0x30] sm:$0xff]  ;;  %v236_v22 = vld [vmem:[%s1110_s15 + $0x38] sm:$0xff]  ;;  %v237_v23 = vld [vmem:[%s1110_s15 + $0x40] sm:$0xff]  ;;  %989 = vmatpush3.bf16.msra.mxu1 %v558_v62 }
  0x13   : > { %952 = vmatprep.mubr.msk.bf16.mxu0 %vm290_vm0, %v261_v15  ;;  %v238_v24 = vld [vmem:[%s1110_s15 + $0x48] sm:$0xff]  ;;  %v264_v25 = vpack.c.bf16 %v236_v22, %v235_v21  ;;  %v239_v27 = vld [vmem:[%s1110_s15 + $0x50] sm:$0xff]  ;;  %v240_v28 = vld [vmem:[%s1110_s15 + $0x58] sm:$0xff]  ;;  %990 = vmatprep.subr.bf16.mxu1 %v559_v1 }
  0x14   : > { %953 = vmatmul.mubr.msk.bf16.vlgmr.msra.gmra.mrb[0].mxu0 %vm290_vm0, %v262_v19  ;;  %v265_v26 = vpack.c.bf16 %v238_v24, %v237_v23  ;;  %v241_v29 = vld [vmem:[%s1110_s15 + $0x60] sm:$0xff]  ;;  %v242_v30 = vld [vmem:[%s1110_s15 + $0x68] sm:$0xff]  ;;  %v266_v31 = vpack.c.bf16 %v240_v28, %v239_v27  ;;  %v243_v33 = vld [vmem:[%s1110_s15 + $0x70] sm:$0xff] }
  0x15   : > { %956 = vmatprep.mubr.msk.bf16.mxu0 %vm290_vm0, %v263_v20  ;;  %v267_v32 = vpack.c.bf16 %v242_v30, %v241_v29  ;;  %v244_v34 = vld [vmem:[%s1110_s15 + $0x78] sm:$0xff]  ;;  %v245_v35 = vld [vmem:[%s1110_s15 + $0x80] sm:$0xff]  ;;  %v246_v36 = vld [vmem:[%s1110_s15 + $0x88] sm:$0xff] }
  0x16   : > { %v268_v37 = vpack.c.bf16 %v244_v34, %v243_v33  ;;  %v269_v38 = vpack.c.bf16 %v246_v36, %v245_v35  ;;  %v247_v39 = vld [vmem:[%s1110_s15 + $0x90] sm:$0xff]  ;;  %v248_v40 = vld [vmem:[%s1110_s15 + $0x98] sm:$0xff]  ;;  %v249_v41 = vld [vmem:[%s1110_s15 + $0xa0] sm:$0xff]  ;;  %991 = vmatpush3.bf16.msra.mxu1 %v559_v1 }
  0x17   : > { %v250_v42 = vld [vmem:[%s1110_s15 + $0xa8] sm:$0xff]  ;;  %v270_v43 = vpack.c.bf16 %v248_v40, %v247_v39  ;;  %v251_v45 = vld [vmem:[%s1110_s15 + $0xb0] sm:$0xff]  ;;  %v252_v46 = vld [vmem:[%s1110_s15 + $0xb8] sm:$0xff] }
  0x18   : > { %v271_v44 = vpack.c.bf16 %v250_v42, %v249_v41  ;;  %v253_v47 = vld [vmem:[%s1110_s15 + $0xc0] sm:$0xff]  ;;  %v254_v48 = vld [vmem:[%s1110_s15 + $0xc8] sm:$0xff]  ;;  %v272_v49 = vpack.c.bf16 %v252_v46, %v251_v45  ;;  %v255_v51 = vld [vmem:[%s1110_s15 + $0xd0] sm:$0xff] }
  0x19   : > { %v273_v50 = vpack.c.bf16 %v254_v48, %v253_v47  ;;  %v256_v52 = vld [vmem:[%s1110_s15 + $0xd8] sm:$0xff]  ;;  %v257_v53 = vld [vmem:[%s1110_s15 + $0xe0] sm:$0xff]  ;;  %v258_v54 = vld [vmem:[%s1110_s15 + $0xe8] sm:$0xff] }
  0x1a   : > { %v274_v55 = vpack.c.bf16 %v256_v52, %v255_v51  ;;  %v275_v56 = vpack.c.bf16 %v258_v54, %v257_v53  ;;  %v259_v57 = vld [vmem:[%s1110_s15 + $0xf0] sm:$0xff]  ;;  %v260_v58 = vld [vmem:[%s1110_s15 + $0xf8] sm:$0xff] }
  0x1b   : > { %v276_v59 = vpack.c.bf16 %v260_v58, %v259_v57 }
  0x1c   : > { %957 = vmatmul.mubr.msk.bf16.gmra.mrb[4].mxu0 %vm290_vm0, %v264_v25 }
  0x1d   : > { %960 = vmatprep.mubr.msk.bf16.mxu0 %vm290_vm0, %v265_v26 }
  0x24   : > { %961 = vmatmul.mubr.msk.bf16.gmra.mrb[8].mxu0 %vm290_vm0, %v266_v31 }
  0x25   : > { %964 = vmatprep.mubr.msk.bf16.mxu0 %vm290_vm0, %v267_v32 }
  0x2c   : > { %965 = vmatmul.mubr.msk.bf16.gmra.mrb[12].mxu0 %vm290_vm0, %v268_v37 }
  0x2d   : > { %968 = vmatprep.mubr.msk.bf16.mxu0 %vm290_vm0, %v269_v38 }
  0x34   : > { %969 = vmatmul.mubr.msk.bf16.gmra.mrb[16].mxu0 %vm290_vm0, %v270_v43 }
  0x35   : > { %972 = vmatprep.mubr.msk.bf16.mxu0 %vm290_vm0, %v271_v44 }
  0x3c   : > { %973 = vmatmul.mubr.msk.bf16.gmra.mrb[20].mxu0 %vm290_vm0, %v272_v49 }
  0x3d   : > { %976 = vmatprep.mubr.msk.bf16.mxu0 %vm290_vm0, %v273_v50 }
  0x44   : > { %977 = vmatmul.mubr.msk.bf16.gmra.mrb[24].mxu0 %vm290_vm0, %v274_v55 }
  0x45   : > { %980 = vmatprep.mubr.msk.bf16.mxu0 %vm290_vm0, %v275_v56 }
  0x4c   : > { %981 = vmatmul.mubr.msk.bf16.gmra.mrb[28].mxu0 %vm290_vm0, %v276_v59 }
  0xe7   : > { %v954_v3 = vpop.f32.mrb[0].mxu0 }
  0xe8   : > { %v382_v4 = vadd.f32 %v954_v3, %v1175_v2  ;;  %v373_v5 = vpop.f32.mrb[1].mxu0 }
  0xe9   : > { %v374_v6 = vadd.f32 %v1175_v2, %v373_v5  ;;  %v955_v7 = vpop.f32.mrb[2].mxu0 }
  0xea   : > { %v385_v8 = vadd.f32 %v955_v7, %v1175_v2  ;;  %v376_v9 = vpop.f32.mrb[3].mxu0  ;;  %v502_v11 = vmax.f32 %v382_v4, 0.0 }
  0xeb   : > { %v377_v10 = vadd.f32 %v1175_v2, %v376_v9  ;;  %v500_v13 = vmax.f32 %v374_v6, 0.0 }
  0xec   : > { %v503_v12 = vmax.f32 %v385_v8, 0.0 }
  0xed   : > { %v501_v14 = vmax.f32 %v377_v10, 0.0 }
  0xee   : > { %v533_v15 = vpack.c.bf16 %v503_v12, %v502_v11 }
  0xef   : > { %v958_v16 = vpop.f32.mrb[4].mxu0  ;;  %v532_v17 = vpack.c.bf16 %v501_v14, %v500_v13 }
  0xf0   : > { %v398_v18 = vadd.f32 %v958_v16, %v1175_v2  ;;  %v389_v19 = vpop.f32.mrb[5].mxu0 }
  0xf1   : > { %v390_v20 = vadd.f32 %v1175_v2, %v389_v19  ;;  %v959_v21 = vpop.f32.mrb[6].mxu0  ;;  %992 = vmatprep.mubr.msk.bf16.mxu1 %vm567_vm1, %v532_v17 }
  0xf2   : > { %v401_v22 = vadd.f32 %v959_v21, %v1175_v2  ;;  %v392_v23 = vpop.f32.mrb[7].mxu0  ;;  %993 = vmatmul.mubr.msk.bf16.vlgmr.msra.gmra.mrb[0].mxu1 %vm567_vm1, %v533_v15  ;;  %v506_v25 = vmax.f32 %v398_v18, 0.0 }
  0xf3   : > { %v393_v24 = vadd.f32 %v1175_v2, %v392_v23  ;;  %v504_v27 = vmax.f32 %v390_v20, 0.0 }
  0xf4   : > { %v507_v26 = vmax.f32 %v401_v22, 0.0 }
  0xf5   : > { %v505_v28 = vmax.f32 %v393_v24, 0.0 }
  0xf6   : > { %v535_v29 = vpack.c.bf16 %v507_v26, %v506_v25 }
  0xf7   : > { %v534_v30 = vpack.c.bf16 %v505_v28, %v504_v27  ;;  %v962_v31 = vpop.f32.mrb[8].mxu0 }
  0xf8   : > { %v414_v32 = vadd.f32 %v962_v31, %v1175_v2  ;;  %v405_v33 = vpop.f32.mrb[9].mxu0 }
  0xf9   : > { %v406_v34 = vadd.f32 %v1175_v2, %v405_v33  ;;  %v963_v35 = vpop.f32.mrb[10].mxu0  ;;  %996 = vmatprep.mubr.msk.bf16.mxu1 %vm567_vm1, %v534_v30 }
  0xfa   : > { %v417_v36 = vadd.f32 %v963_v35, %v1175_v2  ;;  %v408_v37 = vpop.f32.mrb[11].mxu0  ;;  %997 = vmatmul.mubr.msk.bf16.gmra.mrb[4].mxu1 %vm567_vm1, %v535_v29  ;;  %v510_v39 = vmax.f32 %v414_v32, 0.0 }
  0xfb   : > { %v409_v38 = vadd.f32 %v1175_v2, %v408_v37  ;;  %v508_v41 = vmax.f32 %v406_v34, 0.0 }
  0xfc   : > { %v511_v40 = vmax.f32 %v417_v36, 0.0 }
  0xfd   : > { %v509_v42 = vmax.f32 %v409_v38, 0.0 }
  0xfe   : > { %v537_v43 = vpack.c.bf16 %v511_v40, %v510_v39 }
  0xff   : > { %v536_v44 = vpack.c.bf16 %v509_v42, %v508_v41  ;;  %v966_v45 = vpop.f32.mrb[12].mxu0 }
 0x100   : > { %v430_v46 = vadd.f32 %v966_v45, %v1175_v2  ;;  %v421_v47 = vpop.f32.mrb[13].mxu0 }
 0x101   : > { %v422_v48 = vadd.f32 %v1175_v2, %v421_v47  ;;  %v967_v49 = vpop.f32.mrb[14].mxu0  ;;  %1000 = vmatprep.mubr.msk.bf16.mxu1 %vm567_vm1, %v536_v44 }
 0x102   : > { %v433_v50 = vadd.f32 %v967_v49, %v1175_v2  ;;  %v424_v51 = vpop.f32.mrb[15].mxu0  ;;  %1001 = vmatmul.mubr.msk.bf16.gmra.mrb[8].mxu1 %vm567_vm1, %v537_v43  ;;  %v514_v53 = vmax.f32 %v430_v46, 0.0 }
 0x103   : > { %v425_v52 = vadd.f32 %v1175_v2, %v424_v51  ;;  %v512_v55 = vmax.f32 %v422_v48, 0.0 }
 0x104   : > { %v515_v54 = vmax.f32 %v433_v50, 0.0 }
 0x105   : > { %v513_v56 = vmax.f32 %v425_v52, 0.0  ;;  %v1228_v52 = vld [vmem:[%s1340_s4] ss:$0 sm:$0xff] }
 0x106   : > { %v539_v57 = vpack.c.bf16 %v515_v54, %v514_v53 }
 0x107   : > { %v538_v58 = vpack.c.bf16 %v513_v56, %v512_v55  ;;  %v970_v59 = vpop.f32.mrb[16].mxu0 }
 0x108   : > { %v446_v60 = vadd.f32 %v970_v59, %v1175_v2  ;;  %v437_v61 = vpop.f32.mrb[17].mxu0 }
 0x109   : > { %v438_v62 = vadd.f32 %v1175_v2, %v437_v61  ;;  %v971_v63 = vpop.f32.mrb[18].mxu0  ;;  %1004 = vmatprep.mubr.msk.bf16.mxu1 %vm567_vm1, %v538_v58 }
 0x10a   : > { %v449_v0 = vadd.f32 %v971_v63, %v1175_v2  ;;  %v440_v1 = vpop.f32.mrb[19].mxu0  ;;  %1005 = vmatmul.mubr.msk.bf16.gmra.mrb[12].mxu1 %vm567_vm1, %v539_v57  ;;  %v518_v4 = vmax.f32 %v446_v60, 0.0 }
 0x10b   : > { %v441_v3 = vadd.f32 %v1175_v2, %v440_v1  ;;  %v516_v6 = vmax.f32 %v438_v62, 0.0 }
 0x10c   : > { %v519_v5 = vmax.f32 %v449_v0, 0.0 }
 0x10d   : > { %v517_v7 = vmax.f32 %v441_v3, 0.0 }
 0x10e   : > { %v541_v8 = vpack.c.bf16 %v519_v5, %v518_v4 }
 0x10f   : > { %v540_v9 = vpack.c.bf16 %v517_v7, %v516_v6  ;;  %v974_v10 = vpop.f32.mrb[20].mxu0 }
 0x110   : > { %v462_v11 = vadd.f32 %v974_v10, %v1175_v2  ;;  %v453_v12 = vpop.f32.mrb[21].mxu0 }
 0x111   : > { %v454_v13 = vadd.f32 %v1175_v2, %v453_v12  ;;  %v975_v14 = vpop.f32.mrb[22].mxu0  ;;  %1008 = vmatprep.mubr.msk.bf16.mxu1 %vm567_vm1, %v540_v9 }
 0x112   : > { %v465_v15 = vadd.f32 %v975_v14, %v1175_v2  ;;  %v456_v16 = vpop.f32.mrb[23].mxu0  ;;  %1009 = vmatmul.mubr.msk.bf16.gmra.mrb[16].mxu1 %vm567_vm1, %v541_v8  ;;  %v522_v18 = vmax.f32 %v462_v11, 0.0 }
 0x113   : > { %v457_v17 = vadd.f32 %v1175_v2, %v456_v16  ;;  %v520_v20 = vmax.f32 %v454_v13, 0.0 }
 0x114   : > { %v523_v19 = vmax.f32 %v465_v15, 0.0 }
 0x115   : > { %v521_v21 = vmax.f32 %v457_v17, 0.0 }
 0x116   : > { %v543_v22 = vpack.c.bf16 %v523_v19, %v522_v18 }
 0x117   : > { %v542_v23 = vpack.c.bf16 %v521_v21, %v520_v20  ;;  %v978_v24 = vpop.f32.mrb[24].mxu0 }
 0x118   : > { %v478_v25 = vadd.f32 %v978_v24, %v1175_v2  ;;  %v469_v26 = vpop.f32.mrb[25].mxu0 }
 0x119   : > { %v470_v27 = vadd.f32 %v1175_v2, %v469_v26  ;;  %v979_v28 = vpop.f32.mrb[26].mxu0  ;;  %1012 = vmatprep.mubr.msk.bf16.mxu1 %vm567_vm1, %v542_v23 }
 0x11a   : > { %v481_v29 = vadd.f32 %v979_v28, %v1175_v2  ;;  %v472_v30 = vpop.f32.mrb[27].mxu0  ;;  %1013 = vmatmul.mubr.msk.bf16.gmra.mrb[20].mxu1 %vm567_vm1, %v543_v22  ;;  %v526_v32 = vmax.f32 %v478_v25, 0.0 }
 0x11b   : > { %v473_v31 = vadd.f32 %v1175_v2, %v472_v30  ;;  %v524_v34 = vmax.f32 %v470_v27, 0.0 }
 0x11c   : > { %v527_v33 = vmax.f32 %v481_v29, 0.0 }
 0x11d   : > { %v525_v35 = vmax.f32 %v473_v31, 0.0 }
 0x11e   : > { %v545_v36 = vpack.c.bf16 %v527_v33, %v526_v32 }
 0x11f   : > { %v544_v37 = vpack.c.bf16 %v525_v35, %v524_v34  ;;  %v982_v38 = vpop.f32.mrb[28].mxu0 }
 0x120   : > { %v494_v39 = vadd.f32 %v982_v38, %v1175_v2  ;;  %v485_v40 = vpop.f32.mrb[29].mxu0 }
 0x121   : > { %v486_v41 = vadd.f32 %v1175_v2, %v485_v40  ;;  %v983_v42 = vpop.f32.mrb[30].mxu0  ;;  %1016 = vmatprep.mubr.msk.bf16.mxu1 %vm567_vm1, %v544_v37 }
 0x122   : > { %v497_v43 = vadd.f32 %v983_v42, %v1175_v2  ;;  %v488_v44 = vpop.f32.mrb[31].mxu0  ;;  %1017 = vmatmul.mubr.msk.bf16.gmra.mrb[24].mxu1 %vm567_vm1, %v545_v36  ;;  %v530_v46 = vmax.f32 %v494_v39, 0.0 }
 0x123   : > { %v489_v45 = vadd.f32 %v1175_v2, %v488_v44  ;;  %v528_v48 = vmax.f32 %v486_v41, 0.0 }
 0x124   : > { %v531_v47 = vmax.f32 %v497_v43, 0.0 }
 0x125   : > { %v529_v49 = vmax.f32 %v489_v45, 0.0 }
 0x126   : > { %v547_v50 = vpack.c.bf16 %v531_v47, %v530_v46 }
 0x127   : > { %v546_v51 = vpack.c.bf16 %v529_v49, %v528_v48 }
 0x129   : > { %1020 = vmatprep.mubr.msk.bf16.mxu1 %vm567_vm1, %v546_v51 }
 0x12a   : > { %1021 = vmatmul.mubr.msk.bf16.gmra.mrb[28].mxu1 %vm567_vm1, %v547_v50 }
 0x1c5   : > { %v994_v2 = vpop.f32.mrb[0].mxu1 }
 0x1c6   : > { %v659_v53 = vadd.f32 %v994_v2, %v1228_v52  ;;  %v650_v54 = vpop.f32.mrb[1].mxu1 }
 0x1c7   : > { %v651_v55 = vadd.f32 %v1228_v52, %v650_v54  ;;  %v995_v56 = vpop.f32.mrb[2].mxu1 }
 0x1c8   : > { %779 = vst.msk [vmem:[%s1235_s7 + $0x10] sm:$0xff] %vm290_vm0, %v659_v53  ;;  %v662_v57 = vadd.f32 %v995_v56, %v1228_v52  ;;  %v653_v58 = vpop.f32.mrb[3].mxu1 }
 0x1c9   : > { %777 = vst.msk [vmem:[%s1235_s7] sm:$0xff] %vm290_vm0, %v651_v55  ;;  %v654_v59 = vadd.f32 %v1228_v52, %v653_v58 }
 0x1ca   : > { %780 = vst.msk [vmem:[%s1235_s7 + $0x18] sm:$0xff] %vm290_vm0, %v662_v57 }
 0x1cb   : > { %778 = vst.msk [vmem:[%s1235_s7 + $0x8] sm:$0xff] %vm290_vm0, %v654_v59 }
 0x1cd   : > { %v998_v60 = vpop.f32.mrb[4].mxu1 }
 0x1ce   : > { %v675_v61 = vadd.f32 %v998_v60, %v1228_v52  ;;  %v666_v62 = vpop.f32.mrb[5].mxu1 }
 0x1cf   : > { %v667_v63 = vadd.f32 %v1228_v52, %v666_v62  ;;  %v999_v0 = vpop.f32.mrb[6].mxu1 }
 0x1d0   : > { %783 = vst.msk [vmem:[%s1235_s7 + $0x30] sm:$0xff] %vm290_vm0, %v675_v61  ;;  %v678_v1 = vadd.f32 %v999_v0, %v1228_v52  ;;  %v669_v3 = vpop.f32.mrb[7].mxu1 }
 0x1d1   : > { %781 = vst.msk [vmem:[%s1235_s7 + $0x20] sm:$0xff] %vm290_vm0, %v667_v63  ;;  %v670_v4 = vadd.f32 %v1228_v52, %v669_v3 }
 0x1d2   : > { %784 = vst.msk [vmem:[%s1235_s7 + $0x38] sm:$0xff] %vm290_vm0, %v678_v1 }
 0x1d3   : > { %782 = vst.msk [vmem:[%s1235_s7 + $0x28] sm:$0xff] %vm290_vm0, %v670_v4 }
 0x1d5   : > { %v1002_v5 = vpop.f32.mrb[8].mxu1 }
 0x1d6   : > { %v691_v6 = vadd.f32 %v1002_v5, %v1228_v52  ;;  %v682_v7 = vpop.f32.mrb[9].mxu1 }
 0x1d7   : > { %v683_v8 = vadd.f32 %v1228_v52, %v682_v7  ;;  %v1003_v9 = vpop.f32.mrb[10].mxu1 }
 0x1d8   : > { %787 = vst.msk [vmem:[%s1235_s7 + $0x50] sm:$0xff] %vm290_vm0, %v691_v6  ;;  %v694_v10 = vadd.f32 %v1003_v9, %v1228_v52  ;;  %v685_v11 = vpop.f32.mrb[11].mxu1 }
 0x1d9   : > { %785 = vst.msk [vmem:[%s1235_s7 + $0x40] sm:$0xff] %vm290_vm0, %v683_v8  ;;  %v686_v12 = vadd.f32 %v1228_v52, %v685_v11 }
 0x1da   : > { %788 = vst.msk [vmem:[%s1235_s7 + $0x58] sm:$0xff] %vm290_vm0, %v694_v10 }
 0x1db   : > { %786 = vst.msk [vmem:[%s1235_s7 + $0x48] sm:$0xff] %vm290_vm0, %v686_v12 }
 0x1dd   : > { %v1006_v13 = vpop.f32.mrb[12].mxu1 }
 0x1de   : > { %v707_v14 = vadd.f32 %v1006_v13, %v1228_v52  ;;  %v698_v15 = vpop.f32.mrb[13].mxu1 }
 0x1df   : > { %v699_v16 = vadd.f32 %v1228_v52, %v698_v15  ;;  %v1007_v17 = vpop.f32.mrb[14].mxu1 }
 0x1e0   : > { %791 = vst.msk [vmem:[%s1235_s7 + $0x70] sm:$0xff] %vm290_vm0, %v707_v14  ;;  %v710_v18 = vadd.f32 %v1007_v17, %v1228_v52  ;;  %v701_v19 = vpop.f32.mrb[15].mxu1 }
 0x1e1   : > { %789 = vst.msk [vmem:[%s1235_s7 + $0x60] sm:$0xff] %vm290_vm0, %v699_v16  ;;  %v702_v20 = vadd.f32 %v1228_v52, %v701_v19 }
 0x1e2   : > { %792 = vst.msk [vmem:[%s1235_s7 + $0x78] sm:$0xff] %vm290_vm0, %v710_v18 }
 0x1e3   : > { %790 = vst.msk [vmem:[%s1235_s7 + $0x68] sm:$0xff] %vm290_vm0, %v702_v20 }
 0x1e5   : > { %v1010_v21 = vpop.f32.mrb[16].mxu1 }
 0x1e6   : > { %v723_v22 = vadd.f32 %v1010_v21, %v1228_v52  ;;  %v714_v23 = vpop.f32.mrb[17].mxu1 }
 0x1e7   : > { %v715_v24 = vadd.f32 %v1228_v52, %v714_v23  ;;  %v1011_v25 = vpop.f32.mrb[18].mxu1 }
 0x1e8   : > { %795 = vst.msk [vmem:[%s1235_s7 + $0x90] sm:$0xff] %vm290_vm0, %v723_v22  ;;  %v726_v26 = vadd.f32 %v1011_v25, %v1228_v52  ;;  %v717_v27 = vpop.f32.mrb[19].mxu1 }
 0x1e9   : > { %793 = vst.msk [vmem:[%s1235_s7 + $0x80] sm:$0xff] %vm290_vm0, %v715_v24  ;;  %v718_v28 = vadd.f32 %v1228_v52, %v717_v27 }
 0x1ea   : > { %796 = vst.msk [vmem:[%s1235_s7 + $0x98] sm:$0xff] %vm290_vm0, %v726_v26 }
 0x1eb   : > { %794 = vst.msk [vmem:[%s1235_s7 + $0x88] sm:$0xff] %vm290_vm0, %v718_v28 }
 0x1ed   : > { %v1014_v29 = vpop.f32.mrb[20].mxu1 }
 0x1ee   : > { %v739_v30 = vadd.f32 %v1014_v29, %v1228_v52  ;;  %v730_v31 = vpop.f32.mrb[21].mxu1 }
 0x1ef   : > { %v731_v32 = vadd.f32 %v1228_v52, %v730_v31  ;;  %v1015_v33 = vpop.f32.mrb[22].mxu1 }
 0x1f0   : > { %799 = vst.msk [vmem:[%s1235_s7 + $0xb0] sm:$0xff] %vm290_vm0, %v739_v30  ;;  %v742_v34 = vadd.f32 %v1015_v33, %v1228_v52  ;;  %v733_v35 = vpop.f32.mrb[23].mxu1 }
 0x1f1   : > { %797 = vst.msk [vmem:[%s1235_s7 + $0xa0] sm:$0xff] %vm290_vm0, %v731_v32  ;;  %v734_v36 = vadd.f32 %v1228_v52, %v733_v35 }
 0x1f2   : > { %800 = vst.msk [vmem:[%s1235_s7 + $0xb8] sm:$0xff] %vm290_vm0, %v742_v34 }
 0x1f3   : > { %798 = vst.msk [vmem:[%s1235_s7 + $0xa8] sm:$0xff] %vm290_vm0, %v734_v36 }
 0x1f5   : > { %v1018_v37 = vpop.f32.mrb[24].mxu1 }
 0x1f6   : > { %v755_v38 = vadd.f32 %v1018_v37, %v1228_v52  ;;  %v746_v39 = vpop.f32.mrb[25].mxu1 }
 0x1f7   : > { %v747_v40 = vadd.f32 %v1228_v52, %v746_v39  ;;  %v1019_v41 = vpop.f32.mrb[26].mxu1 }
 0x1f8   : > { %803 = vst.msk [vmem:[%s1235_s7 + $0xd0] sm:$0xff] %vm290_vm0, %v755_v38  ;;  %v758_v42 = vadd.f32 %v1019_v41, %v1228_v52  ;;  %v749_v43 = vpop.f32.mrb[27].mxu1 }
 0x1f9   : > { %801 = vst.msk [vmem:[%s1235_s7 + $0xc0] sm:$0xff] %vm290_vm0, %v747_v40  ;;  %v750_v44 = vadd.f32 %v1228_v52, %v749_v43 }
 0x1fa   : > { %804 = vst.msk [vmem:[%s1235_s7 + $0xd8] sm:$0xff] %vm290_vm0, %v758_v42 }
 0x1fb   : > { %802 = vst.msk [vmem:[%s1235_s7 + $0xc8] sm:$0xff] %vm290_vm0, %v750_v44 }
 0x1fd   : > { %v1022_v45 = vpop.f32.mrb[28].mxu1 }
 0x1fe   : > { %v771_v46 = vadd.f32 %v1022_v45, %v1228_v52  ;;  %v762_v47 = vpop.f32.mrb[29].mxu1 }
 0x1ff   : > { %v763_v48 = vadd.f32 %v1228_v52, %v762_v47  ;;  %v1023_v49 = vpop.f32.mrb[30].mxu1 }
 0x200   : > { %807 = vst.msk [vmem:[%s1235_s7 + $0xf0] sm:$0xff] %vm290_vm0, %v771_v46  ;;  %v774_v50 = vadd.f32 %v1023_v49, %v1228_v52  ;;  %v765_v51 = vpop.f32.mrb[31].mxu1 }
 0x201   : > { %805 = vst.msk [vmem:[%s1235_s7 + $0xe0] sm:$0xff] %vm290_vm0, %v763_v48  ;;  %v766_v2 = vadd.f32 %v1228_v52, %v765_v51 }
 0x202   : > { %808 = vst.msk [vmem:[%s1235_s7 + $0xf8] sm:$0xff] %vm290_vm0, %v774_v50 }
 0x203   : > { %806 = vst.msk [vmem:[%s1235_s7 + $0xe8] sm:$0xff] %vm290_vm0, %v766_v2 }
 0x204 PF: > { %s15_s18 = sadd.s32 1, %s1038_s18  }
 0x205   : > { %p12_p4 = scmp.ge.s32.totalorder %s15_s18, 6  }
 0x207   :  { %14 = sbr.rel (!%p12_p4) target bundleno = 1 (0x1), region = 70 }

</bundles_post_ra>
